<compile_context>
chip_gen: v7x
topology: tpu7x:2x2x1
jax: 0.10.0
libtpu: 0.0.40
codegen_flags: <defaults>
</compile_context>

<pallas_src>
import functools
import math
import numpy as np
import jax
import jax.numpy as jnp
from jax.experimental import pallas as pl
from jax.experimental.pallas import tpu as pltpu


def _round_up(x, m):
    return ((x + m - 1) // m) * m


# ---------------------------------------------------------------------------
# Deterministic constants (fused window*DFT weights, mel filterbank) -- bf16
# ---------------------------------------------------------------------------
def _hz_to_mel_htk(f):
    return 2595.0 * np.log10(1.0 + f / 700.0)


def _mel_to_hz_htk(m):
    return 700.0 * (10.0 ** (m / 2595.0) - 1.0)


def _make_mel_filterbank(n_freqs, n_mels, sample_rate, f_min=0.0, f_max=None):
    """Replicates torchaudio.functional.melscale_fbanks(mel_scale='htk', norm=None)."""
    if f_max is None:
        f_max = sample_rate / 2.0
    all_freqs = np.linspace(0.0, sample_rate // 2, n_freqs)           # (n_freqs,)
    m_min = _hz_to_mel_htk(f_min)
    m_max = _hz_to_mel_htk(f_max)
    m_pts = np.linspace(m_min, m_max, n_mels + 2)
    f_pts = _mel_to_hz_htk(m_pts)                                     # (n_mels+2,)
    f_diff = f_pts[1:] - f_pts[:-1]                                   # (n_mels+1,)
    slopes = f_pts[None, :] - all_freqs[:, None]                      # (n_freqs, n_mels+2)
    down_slopes = (-1.0 * slopes[:, :-2]) / f_diff[:-1]
    up_slopes = slopes[:, 2:] / f_diff[1:]
    fb = np.maximum(0.0, np.minimum(down_slopes, up_slopes))          # (n_freqs, n_mels)
    return fb.astype(np.float64)


@functools.lru_cache(maxsize=None)
def _fbank_constants(n_fft, hop_length, n_mels, sample_rate):
    """Fused (hann window * one-sided DFT) weights and zero-padded mel filterbank.

    Returns (both bf16, f32 accumulation happens on the MXU):
      w_all: (n_fft, 2*f_pad), row n = sample offset n of the window;
             cols [0, n_freqs) = w[n]*cos, cols [f_pad, f_pad+n_freqs) = w[n]*sin.
      fb:    (f_pad, m_pad) mel filterbank, zero-padded to 128-multiples.
    """
    n_freqs = n_fft // 2 + 1
    f_pad = _round_up(n_freqs, 128)
    m_pad = _round_up(n_mels, 128)

    n = np.arange(n_fft, dtype=np.float64)
    win = 0.5 - 0.5 * np.cos(2.0 * np.pi * n / n_fft)                 # periodic Hann
    ang = 2.0 * np.pi * n[:, None] * np.arange(n_freqs)[None, :] / n_fft
    wcos = win[:, None] * np.cos(ang)
    wsin = win[:, None] * np.sin(ang)                                 # sign irrelevant for |.|^2

    w_all = np.zeros((n_fft, 2 * f_pad), dtype=np.float32)
    w_all[:, :n_freqs] = wcos
    w_all[:, f_pad:f_pad + n_freqs] = wsin

    fb = np.zeros((f_pad, m_pad), dtype=np.float32)
    fb[:n_freqs, :n_mels] = _make_mel_filterbank(n_freqs, n_mels, sample_rate)
    return (jnp.asarray(w_all, dtype=jnp.bfloat16),
            jnp.asarray(fb, dtype=jnp.bfloat16))


# ---------------------------------------------------------------------------
# Pallas kernel: chunk tile -> windowed DFT (bf16 matmuls, f32 acc) -> power
#                -> mel (bf16 matmul, f32 acc) -> log
# ---------------------------------------------------------------------------
def _build_kernel(tf_, hop, n_q, n_fft, f_pad, halo):
    def kernel(chunks_ref, halo_ref, w_ref, fb_ref, out_ref, scr_ref):
        # Assemble TF + halo chunk rows contiguously in VMEM (sublane-aligned stores).
        scr_ref[0:tf_, :] = chunks_ref[0]
        scr_ref[tf_:tf_ + halo, :] = halo_ref[0]
        c = scr_ref[...]                                              # (tf_+halo, hop) f32

        # Windowed one-sided DFT as n_q row-shifted bf16 matmuls (f32 accumulation):
        #   y[f, :] = sum_q chunks[f + q, :kw_q] @ W[q*hop : q*hop + kw_q, :]
        # The final segment is truncated to kw = n_fft - q*hop (window is zero past
        # n_fft) -> drops one 128-K MXU pass on v5e, free on v6e/v7x.
        y = None
        for q in range(n_q):
            k0 = q * hop
            kw = min(hop, n_fft - k0)
            lhs = c[q:q + tf_, 0:kw].astype(jnp.bfloat16)
            d = jnp.dot(lhs, w_ref[k0:k0 + kw, :],
                        preferred_element_type=jnp.float32)           # (tf_, 2*f_pad) f32
            y = d if y is None else y + d

        re = y[:, :f_pad]
        im = y[:, f_pad:]
        power = re * re + im * im                                     # |STFT|^2 (power=2.0), f32
        mel = jnp.dot(power.astype(jnp.bfloat16), fb_ref[...],
                      preferred_element_type=jnp.float32)             # (tf_, m_pad) f32
        out_ref[0] = jnp.log(mel + 1e-6)                              # lane-dense 128-wide store
    return kernel


def fbank_forward(waveform, n_mels, sample_rate=16000, n_fft=400, hop_length=160,
                  frame_tile=512):
    """waveform: (batch, time) float. Returns (batch, n_mels, n_frames) like PyTorch."""
    waveform = jnp.asarray(waveform, dtype=jnp.float32)
    B, T = waveform.shape
    n_freqs = n_fft // 2 + 1
    f_pad = _round_up(n_freqs, 128)
    m_pad = _round_up(n_mels, 128)
    n_q = math.ceil(n_fft / hop_length)
    halo = 8
    assert n_q - 1 <= halo, "halo of one 8-row block assumes n_fft <= 9 * hop_length"
    pad = n_fft // 2
    assert T > pad, f"reflect padding (center=True) requires time > n_fft//2={pad}, got {T}"

    n_frames = 1 + T // hop_length
    # Frame-tile size: as large as reasonable (amortizes per-step pipeline overhead);
    # VMEM footprint stays far below the scoped limit even at 512.
    tf_ = min(frame_tile, _round_up(n_frames, 8))
    n_tiles = -(-n_frames // tf_)
    # v7x has 2 TensorCores: ensure the "parallel" grid has >=2 programs when possible.
    if B * n_tiles < 2 and n_frames > 8:
        tf_ = _round_up(-(-n_frames // 2), 8)
        n_tiles = -(-n_frames // tf_)
    n_frames_pad = n_tiles * tf_
    n_chunk_rows = n_frames_pad + halo
    total = n_chunk_rows * hop_length

    # center=True reflect padding (matches torch.stft) plus zero tail so samples
    # reshape exactly into hop-sized chunk rows -- fused into ONE concatenate
    # (single HBM pass; the tail only feeds discarded padded frames).
    left = waveform[:, 1:pad + 1][:, ::-1]
    right = waveform[:, T - pad - 1:T - 1][:, ::-1]
    tail = jnp.zeros((B, total - (T + 2 * pad)), dtype=jnp.float32)
    padded = jnp.concatenate([left, waveform, right, tail], axis=1)
    chunks = padded.reshape(B, n_chunk_rows, hop_length)              # pure reshape, no gather

    w_all, fb = _fbank_constants(n_fft, hop_length, n_mels, sample_rate)

    kernel = _build_kernel(tf_, hop_length, n_q, n_fft, f_pad, halo)
    out = pl.pallas_call(
        kernel,
        out_shape=jax.ShapeDtypeStruct((B, n_frames_pad, m_pad), jnp.float32),
        grid=(B, n_tiles),
        in_specs=[
            pl.BlockSpec((1, tf_, hop_length), lambda b, i: (b, i, 0)),            # main chunk tile
            pl.BlockSpec((1, halo, hop_length),
                         lambda b, i: (b, (i + 1) * (tf_ // halo), 0)),            # halo rows
            pl.BlockSpec((n_fft, 2 * f_pad), lambda b, i: (0, 0)),                 # fused window*DFT (bf16)
            pl.BlockSpec((f_pad, m_pad), lambda b, i: (0, 0)),                     # mel filterbank (bf16)
        ],
        out_specs=pl.BlockSpec((1, tf_, m_pad), lambda b, i: (b, i, 0)),
        scratch_shapes=[pltpu.VMEM((tf_ + halo, hop_length), jnp.float32)],
        compiler_params=pltpu.CompilerParams(
            dimension_semantics=("parallel", "parallel"),
            vmem_limit_bytes=32 * 1024 * 1024,
        ),
    )(chunks, chunks, w_all, fb)

    # Slice off frame / mel padding, then whole-utterance mean-subtract (wrapper side).
    logmel = out[:, :n_frames, :n_mels]                                # (B, n_frames, n_mels)
    logmel = logmel - jnp.mean(logmel, axis=1, keepdims=True)          # mean over time (frames)
    return jnp.transpose(logmel, (0, 2, 1))                            # (B, n_mels, n_frames)


# ---------------------------------------------------------------------------
# Pure NumPy (float64) reference for validation
# ---------------------------------------------------------------------------
def _reference_fbank_np(waveform, n_mels, sample_rate=16000, n_fft=400, hop_length=160):
    x = np.asarray(waveform, dtype=np.float64)
    B, T = x.shape
    pad = n_fft // 2
    x = np.pad(x, ((0, 0), (pad, pad)), mode="reflect")
    n_frames = 1 + T // hop_length
    idx = np.arange(n_frames)[:, None] * hop_length + np.arange(n_fft)[None, :]
    frames = x[:, idx]                                                 # (B, n_frames, n_fft)
    win = 0.5 - 0.5 * np.cos(2.0 * np.pi * np.arange(n_fft) / n_fft)
    spec = np.fft.rfft(frames * win, n=n_fft, axis=-1)
    power = np.abs(spec) ** 2
    fb = _make_mel_filterbank(n_fft // 2 + 1, n_mels, sample_rate)
    mel = power @ fb
    logmel = np.log(mel + 1e-6)
    logmel = logmel - logmel.mean(axis=1, keepdims=True)
    return np.transpose(logmel, (0, 2, 1))


if __name__ == "__main__":
    key = jax.random.PRNGKey(0)
    batch, time = 2, 800          # 800 samples @ 16 kHz, hop 160 -> 6 frames
    n_mels = 16
    waveform = jax.random.normal(key, (batch, time), dtype=jnp.float32)

    out = fbank_forward(waveform, n_mels=n_mels, sample_rate=16000)
    out = jax.block_until_ready(out)

    assert out.shape == (batch, n_mels, 1 + time // 160), out.shape
    assert out.dtype == jnp.float32
    assert bool(jnp.all(jnp.isfinite(out)))
    # mean over time axis should be ~0 after mean-subtraction
    assert float(jnp.max(jnp.abs(jnp.mean(out, axis=-1)))) < 1e-4
    # cross-check against a float64 NumPy reference (bf16 MXU feeds, f32 accumulation)
    ref = _reference_fbank_np(np.asarray(waveform), n_mels, 16000)
    err = np.abs(np.asarray(out) - ref)
    assert float(err.max()) < 1.2e-1, float(err.max())
    assert float(err.mean()) < 2e-2, float(err.mean())
    print("KERNEL_OK")
</pallas_src>

<mosaic_0001>
module attributes {stable_mosaic.version = 11 : i64} {
  func.func @kernel(%arg0: i32, %arg1: i32, %arg2: memref<1x8x160xf32, #tpu.memory_space<vmem>>, %arg3: memref<1x8x160xf32, #tpu.memory_space<vmem>>, %arg4: memref<400x512xbf16, #tpu.memory_space<vmem>>, %arg5: memref<256x128xbf16, #tpu.memory_space<vmem>>, %arg6: memref<1x8x128xf32, #tpu.memory_space<vmem>>, %arg7: memref<16x160xf32, #tpu.memory_space<vmem>>) attributes {dimension_semantics = [#tpu.dimension_semantics<parallel>, #tpu.dimension_semantics<parallel>], iteration_bounds = array<i64: 2, 1>, scalar_prefetch = 0 : i64, scratch_operands = 1 : i64, tpu.core_type = #tpu.core_type<tc>, window_params = [{transform_indices = @transform_0, window_bounds = array<i64: 1, 8, 160>}, {transform_indices = @transform_1, window_bounds = array<i64: 1, 8, 160>}, {pipeline_mode = #tpu.pipeline_mode<synchronous>, transform_indices = @transform_2, window_bounds = array<i64: 400, 512>}, {pipeline_mode = #tpu.pipeline_mode<synchronous>, transform_indices = @transform_3, window_bounds = array<i64: 256, 128>}, {transform_indices = @transform_4, window_bounds = array<i64: 1, 8, 128>}]} {
    %c0 = arith.constant 0 : index
    %c0_0 = arith.constant 0 : index
    %c0_1 = arith.constant 0 : index
    %0 = vector.load %arg2[%c0, %c0_0, %c0_1] : memref<1x8x160xf32, #tpu.memory_space<vmem>>, vector<1x8x160xf32>
    %1 = vector.shape_cast %0 : vector<1x8x160xf32> to vector<8x160xf32>
    %c0_2 = arith.constant 0 : index
    %c0_3 = arith.constant 0 : index
    %2 = vector.load %arg7[%c0_2, %c0_3] : memref<16x160xf32, #tpu.memory_space<vmem>>, vector<8x160xf32>
    tpu.vector_store %arg7[%c0_2, %c0_3], %1 {strides = array<i32>} : memref<16x160xf32, #tpu.memory_space<vmem>>, vector<8x160xf32>,
    %c0_4 = arith.constant 0 : index
    %c0_5 = arith.constant 0 : index
    %c0_6 = arith.constant 0 : index
    %3 = vector.load %arg3[%c0_4, %c0_5, %c0_6] : memref<1x8x160xf32, #tpu.memory_space<vmem>>, vector<1x8x160xf32>
    %4 = vector.shape_cast %3 : vector<1x8x160xf32> to vector<8x160xf32>
    %c8 = arith.constant 8 : index
    %c0_7 = arith.constant 0 : index
    %5 = vector.load %arg7[%c8, %c0_7] : memref<16x160xf32, #tpu.memory_space<vmem>>, vector<8x160xf32>
    tpu.vector_store %arg7[%c8, %c0_7], %4 {strides = array<i32>} : memref<16x160xf32, #tpu.memory_space<vmem>>, vector<8x160xf32>,
    %c0_8 = arith.constant 0 : index
    %c0_9 = arith.constant 0 : index
    %6 = vector.load %arg7[%c0_8, %c0_9] : memref<16x160xf32, #tpu.memory_space<vmem>>, vector<16x160xf32>
    %7 = vector.extract_strided_slice %6 {offsets = [0, 0], sizes = [8, 160], strides = [1, 1]} : vector<16x160xf32> to vector<8x160xf32>
    %8 = arith.truncf %7 : vector<8x160xf32> to vector<8x160xbf16>
    %c0_10 = arith.constant 0 : index
    %c0_11 = arith.constant 0 : index
    %9 = vector.load %arg4[%c0_10, %c0_11] : memref<400x512xbf16, #tpu.memory_space<vmem>>, vector<160x512xbf16>
    %cst = arith.constant dense<0.000000e+00> : vector<8x512xf32>
    %10 = tpu.matmul %8, %9, %cst {dimension_numbers = #tpu.dot_dimension_numbers<[1], [0], [0], [1], [0, 0, 1, 1], [], []>} : vector<8x160xbf16>, vector<160x512xbf16>, vector<8x512xf32> -> vector<8x512xf32>
    %11 = vector.extract_strided_slice %6 {offsets = [1, 0], sizes = [8, 160], strides = [1, 1]} : vector<16x160xf32> to vector<8x160xf32>
    %12 = arith.truncf %11 : vector<8x160xf32> to vector<8x160xbf16>
    %c160 = arith.constant 160 : index
    %c0_12 = arith.constant 0 : index
    %13 = vector.load %arg4[%c160, %c0_12] : memref<400x512xbf16, #tpu.memory_space<vmem>>, vector<160x512xbf16>
    %cst_13 = arith.constant dense<0.000000e+00> : vector<8x512xf32>
    %14 = tpu.matmul %12, %13, %cst_13 {dimension_numbers = #tpu.dot_dimension_numbers<[1], [0], [0], [1], [0, 0, 1, 1], [], []>} : vector<8x160xbf16>, vector<160x512xbf16>, vector<8x512xf32> -> vector<8x512xf32>
    %15 = arith.addf %10, %14 : vector<8x512xf32>
    %16 = vector.extract_strided_slice %6 {offsets = [2, 0], sizes = [8, 80], strides = [1, 1]} : vector<16x160xf32> to vector<8x80xf32>
    %17 = arith.truncf %16 : vector<8x80xf32> to vector<8x80xbf16>
    %c320 = arith.constant 320 : index
    %c0_14 = arith.constant 0 : index
    %18 = vector.load %arg4[%c320, %c0_14] : memref<400x512xbf16, #tpu.memory_space<vmem>>, vector<80x512xbf16>
    %cst_15 = arith.constant dense<0.000000e+00> : vector<8x512xf32>
    %19 = tpu.matmul %17, %18, %cst_15 {dimension_numbers = #tpu.dot_dimension_numbers<[1], [0], [0], [1], [0, 0, 1, 1], [], []>} : vector<8x80xbf16>, vector<80x512xbf16>, vector<8x512xf32> -> vector<8x512xf32>
    %20 = arith.addf %15, %19 : vector<8x512xf32>
    %21 = vector.extract_strided_slice %20 {offsets = [0, 0], sizes = [8, 256], strides = [1, 1]} : vector<8x512xf32> to vector<8x256xf32>
    %22 = vector.extract_strided_slice %20 {offsets = [0, 256], sizes = [8, 256], strides = [1, 1]} : vector<8x512xf32> to vector<8x256xf32>
    %23 = arith.mulf %21, %21 : vector<8x256xf32>
    %24 = arith.mulf %22, %22 : vector<8x256xf32>
    %25 = arith.addf %23, %24 : vector<8x256xf32>
    %26 = arith.truncf %25 : vector<8x256xf32> to vector<8x256xbf16>
    %c0_16 = arith.constant 0 : index
    %c0_17 = arith.constant 0 : index
    %27 = vector.load %arg5[%c0_16, %c0_17] : memref<256x128xbf16, #tpu.memory_space<vmem>>, vector<256x128xbf16>
    %cst_18 = arith.constant dense<0.000000e+00> : vector<8x128xf32>
    %28 = tpu.matmul %26, %27, %cst_18 {dimension_numbers = #tpu.dot_dimension_numbers<[1], [0], [0], [1], [0, 0, 1, 1], [], []>} : vector<8x256xbf16>, vector<256x128xbf16>, vector<8x128xf32> -> vector<8x128xf32>
    %cst_19 = arith.constant 9.99999997E-7 : f32
    %29 = vector.broadcast %cst_19 : f32 to vector<8x128xf32>
    %30 = arith.addf %28, %29 : vector<8x128xf32>
    %31 = math.log %30 : vector<8x128xf32>
    %c0_20 = arith.constant 0 : index
    %c0_21 = arith.constant 0 : index
    %c0_22 = arith.constant 0 : index
    %32 = vector.load %arg6[%c0_20, %c0_21, %c0_22] : memref<1x8x128xf32, #tpu.memory_space<vmem>>, vector<1x8x128xf32>
    %33 = vector.shape_cast %32 : vector<1x8x128xf32> to vector<8x128xf32>
    %34 = vector.shape_cast %31 : vector<8x128xf32> to vector<1x8x128xf32>
    tpu.vector_store %arg6[%c0_20, %c0_21, %c0_22], %34 {strides = array<i32>} : memref<1x8x128xf32, #tpu.memory_space<vmem>>, vector<1x8x128xf32>,
    return
  }
  func.func @transform_0(%arg0: i32, %arg1: i32) -> (i32, i32, i32) {
    %c0_i32 = arith.constant 0 : i32
    %c0_i32_0 = arith.constant 0 : i32
    return %arg0, %arg1, %c0_i32 : i32, i32, i32
  }
  func.func @transform_1(%arg0: i32, %arg1: i32) -> (i32, i32, i32) {
    %c1_i32 = arith.constant 1 : i32
    %0 = arith.addi %arg1, %c1_i32 : i32
    %c1_i32_0 = arith.constant 1 : i32
    %1 = arith.muli %0, %c1_i32_0 : i32
    %c0_i32 = arith.constant 0 : i32
    %c0_i32_1 = arith.constant 0 : i32
    return %arg0, %1, %c0_i32 : i32, i32, i32
  }
  func.func @transform_2(%arg0: i32, %arg1: i32) -> (i32, i32) {
    %c0_i32 = arith.constant 0 : i32
    %c0_i32_0 = arith.constant 0 : i32
    %c0_i32_1 = arith.constant 0 : i32
    return %c0_i32, %c0_i32_0 : i32, i32
  }
  func.func @transform_3(%arg0: i32, %arg1: i32) -> (i32, i32) {
    %c0_i32 = arith.constant 0 : i32
    %c0_i32_0 = arith.constant 0 : i32
    %c0_i32_1 = arith.constant 0 : i32
    return %c0_i32, %c0_i32_0 : i32, i32
  }
  func.func @transform_4(%arg0: i32, %arg1: i32) -> (i32, i32, i32) {
    %c0_i32 = arith.constant 0 : i32
    %c0_i32_0 = arith.constant 0 : i32
    return %arg0, %arg1, %c0_i32 : i32, i32, i32
  }
}

</mosaic_0001>

<bundles_post_ra>
// kernel: tpu_custom_call.1
= control target key start
LH: loop header
LB: loop body
LE: loop exit
PB: predicated region body
PF: predicated region fallthrough
CT: control target
= control target key end

     0   :  { %s2529_s0 = inlined_call_operand.hbm [shape: f32[2,16,160], index: 0, kind: input, shape index: {}]   ;;  %s2530_s1 = inlined_call_operand.hbm [shape: f32[2,16,160], index: 1, kind: input, shape index: {}]   ;;  %s2531_s2 = inlined_call_operand.hbm [shape: bf16[400,512], index: 2, kind: input, shape index: {}]   ;;  %s2532_s3 = inlined_call_operand.hbm [shape: bf16[256,128], index: 3, kind: input, shape index: {}]   ;;  %s2533_s4 = inlined_call_operand.hbm [shape: f32[2,8,128], index: 4, kind: output, shape index: {}]  }
   0x1   :  { %2539 = sst [smem:[#allocation18_spill]] %s2531_s2 }
   0x2   :  { %2540 = sst [smem:[#allocation19_spill]] %s2532_s3 }
   0x3   :  { %9 = vsyncpa [#allocation4], 0 }
   0x4   :  { %11 = vsyncpa [#allocation4 + $0x1], 0 }
   0x5   :  { %12 = vsyncpa [#allocation7], 0 }
   0x6   :  { %14 = vsyncpa [#allocation7 + $0x1], 0 }
   0x7   :  { %15 = vsyncpa [#allocation10], 0 }
   0x8   :  { %16 = vsyncpa [#allocation5], 0 }
   0x9   :  { %18 = vsyncpa [#allocation5 + $0x1], 0  ;;  %s2215_s15 = smov 0   ;;  %s2217_s16 = smov 0  }
   0xa   :  { %s2219_s17 = smov 0   ;;  %s2221_s18 = smov 0  }
   0xb   :  { %s2223_s19 = smov 0   ;;  %s2225_s20 = smov 0  }
   0xc LB: > { %s2246_s21 = sadd.s32 4294967295, %s2178_s20   ;;  %s1525_s22 = sadd.s32 4294967294, %s2178_s20   ;;  %s2178_s20 = sphi %s2225_s20, %s24_s20   ;;  %s2174_s19 = sphi %s2223_s19, %s2565_s19   ;;  %s2170_s18 = sphi %s2221_s18, %s2564_s18   ;;  %s2166_s17 = sphi %s2219_s17, %s2563_s17   ;;  %s2162_s16 = sphi %s2217_s16, %s2562_s16   ;;  %s2158_s15 = sphi %s2215_s15, %s2561_s15  }
   0xd   : > { %p58_p0 = scmp.ne.s32.totalorder %s2162_s16, %s2158_s15  ;;  %p2534_p1 = scmp.eq.s32.totalorder %s2246_s21, 0 }
   0xe   : > { %p162_p3 = scmp.eq.s32.totalorder %s1525_s22, 1  ;;  %p1526_p5 = scmp.ge.s32.totalorder %s2178_s20, 1 }
   0xf   : > { %p2255_p4 = por %p2534_p1, %p58_p0  ;;  %p169_p7 = scmp.lt.s32.totalorder %s2178_s20, 3 }
  0x10   : > { %p2260_p6 = por %p162_p3, %p58_p0  ;;  %s2180_s26 = smov [#allocation8]  }
  0x11   : > { %s2541_s23 = scalar_select %p2255_p4, 1, 0 }
  0x12   : > { %s2542_s24 = scalar_select %p2260_p6, 1, 0 }
  0x13   : > { %p2265_p8 = pnand %p1526_p5, %p169_p7  ;;  %s181_s27 = sshll.u32 %s2180_s26, 4  ;;  %s2269_s27 = int_to_ptr.vmem [resolvable:$true] %s181_s27 }
  0x14   : > { %s2181_s29 = smov [#allocation9]   ;;  %s2545_s2 = sld [smem:[#allocation18_spill]] }
  0x15   : > { %s2543_s25 = scalar_select %p2265_p8, 1, 0 }
  0x16   : > { %p1720_p9 = pneg %p2265_p8  ;;  %s194_s30 = sshll.u32 %s2181_s29, 4  ;;  %s2280_s30 = int_to_ptr.vmem [resolvable:$true] %s194_s30 }
  0x18   : > { %p2276_p11 = pnand %p1720_p9, %p2534_p1 }
  0x1a   : > { %s1967_s7 = scalar_lea.hbm %s2545_s2, 12800  ;;  %p1969_p13 = pneg %p2276_p11 }
  0x1b   : > { %p1968_p12 = scmp.ne.s32.totalorder %s2545_s2, %s1967_s7  ;;  %p1974_p5 = scmp.lt.u32.totalorder %s1967_s7, %s2545_s2 }
  0x1d   : > { %p1970_p0 = pnand %p1969_p13, %p1968_p12 }
  0x1f   : > { %p1971_p3 = pneg %p1970_p0 }
  0x21   : > { %p1976_p7 = pnand %p1974_p5, %p1971_p3 }
  0x23   : > { %1979 = shalt.err (!%p1976_p7)
}
  0x24   : > { %s1980_s12 = scalar_lea.vmem %s2269_s27, 12800  ;;  %p1988_p2 = scmp.lt.s32.totalorder %s2269_s27, %s2269_s27 }
  0x25   : > { %p1981_p9 = scmp.ne.s32.totalorder %s2269_s27, %s1980_s12  ;;  %p1989_p12 = scmp.lt.s32.totalorder %s1980_s12, %s1980_s12 }
  0x27   : > { %p1983_p10 = pnand %p1981_p9, %p1969_p13  ;;  %p1990_p0 = por %p1989_p12, %p1988_p2 }
  0x29   : > { %p1984_p1 = pneg %p1983_p10 }
  0x2b   : > { %p1991_p6 = pnand %p1990_p0, %p1984_p1 }
  0x2d   : > { %1994 = shalt.err (!%p1991_p6)
}
  0x2e   : > { %s2182_s13 = smov 256   ;;  %s2183_s14 = smov 16  }
  0x2f   : > { %1723 = dma.hbm_to_vmem [thread:$0]  (!%p2276_p11), %s2545_s2, 12800, %s2269_s27, [#allocation7], %s2182_s13, %s2182_s13, %s2183_s14  }
  0x30   : > { %s2546_s3 = sld [smem:[#allocation19_spill]] }
  0x36   : > { %s1995_s6 = scalar_lea.hbm %s2546_s3, 2048 }
  0x37   : > { %p1996_p2 = scmp.ne.s32.totalorder %s2546_s3, %s1995_s6  ;;  %p2002_p10 = scmp.lt.u32.totalorder %s1995_s6, %s2546_s3 }
  0x39   : > { %p1998_p1 = pnand %p1996_p2, %p1969_p13 }
  0x3b   : > { %p1999_p6 = pneg %p1998_p1 }
  0x3d   : > { %p2004_p3 = pnand %p2002_p10, %p1999_p6 }
  0x3f   : > { %2007 = shalt.err (!%p2004_p3)
}
  0x40   : > { %s2008_s27 = scalar_lea.vmem %s2280_s30, 2048  ;;  %p2016_p12 = scmp.lt.s32.totalorder %s2280_s30, %s2280_s30 }
  0x41   : > { %p2009_p5 = scmp.ne.s32.totalorder %s2280_s30, %s2008_s27  ;;  %p2017_p0 = scmp.lt.s32.totalorder %s2008_s27, %s2008_s27 }
  0x43   : > { %p2011_p7 = pnand %p2009_p5, %p1969_p13  ;;  %p2018_p2 = por %p2017_p0, %p2016_p12 }
  0x45   : > { %p2012_p9 = pneg %p2011_p7 }
  0x47   : > { %p2019_p1 = pnand %p2018_p2, %p2012_p9 }
  0x49   : > { %2022 = shalt.err (!%p2019_p1)
}
  0x4a   : > { %s2184_s11 = smov 64   ;;  %s2185_s12 = smov 4  }
  0x4b   : > { %1726 = dma.hbm_to_vmem [thread:$0]  (!%p2276_p11), %s2546_s3, 2048, %s2280_s30, [#allocation10], %s2184_s11, %s2184_s11, %s2185_s12  }
  0x4c   : > { %s36_s22 = sadd.s32 1, %s2174_s19  ;;  %s45_s26 = sadd.s32 1, %s2166_s17 }
  0x4d   : > { %p38_p13 = scmp.ge.s32.totalorder %s36_s22, 2  ;;  %p52_p6 = scmp.ne.s32.totalorder %s2166_s17, %s2162_s16 }
  0x4e   : > { %p53_p10 = scmp.eq.s32.totalorder %s2178_s20, 0  ;;  %p1740_p3 = scmp.lt.s32.totalorder %s2178_s20, 2 }
  0x4f   : > { %s2567_s22 = smov (%p38_p13, %s36_s22), 0  ;;  %p2548_p7 = scmp.eq.s32.totalorder %s2246_s21, 1 }
  0x50   : > { %2547 = sst [smem:[#allocation17_spill]] %s2567_s22  ;;  %p54_p5 = por %p53_p10, %p52_p6 }
  0x51   : > { %p2344_p9 = por %p2548_p7, %p52_p6  ;;  %s40_s28 = ssub.s32 %s2174_s19, %s2567_s22 }
  0x52   : > { %s208_s5 = sand.u32 1, %s2166_s17   ;;  %p43_p12 = scmp.eq.s32.totalorder %s40_s28, 0 }
  0x53   : > { %s2549_s29 = scalar_select %p2344_p9, 1, 0 }
  0x54   : > { %s2351_s30 = sshll.u32 %s208_s5, 4  ;;  %s1668_s6 = sshll.u32 %s2174_s19, 9 }
  0x55   : > { %s2355_s7 = scalar_select %p43_p12, %s2166_s17, %s45_s26  }
  0x56   : > { %s2360_s10 = scalar_lea.hbm %s2529_s0, %s1668_s6  ;;  %s212_s27 = scalar_lea.vmem [#allocation3], %s2351_s30 }
  0x57   : > { %s222_s11 = sshll.u32 %s212_s27, 4  ;;  %p2365_p11 = pnand %p1740_p3, %p54_p5  ;;  %s2369_s11 = int_to_ptr.vmem [resolvable:$true] %s222_s11 }
  0x58   : > { %s2374_s26 = scalar_lea.hbm %s2530_s1, %s1668_s6  ;;  %s209_s28 = scalar_lea.sflag [#allocation4], %s208_s5 }
  0x59   : > { %s2023_s8 = scalar_lea.hbm %s2360_s10, 256  ;;  %p2025_p2 = pneg %p2365_p11 }
  0x5a   : > { %p2024_p0 = scmp.ne.s32.totalorder %s2360_s10, %s2023_s8  ;;  %s2028_s2 = scalar_lea.hbm %s2529_s0, 1024 }
  0x5b   : > { %p2029_p6 = scmp.lt.u32.totalorder %s2360_s10, %s2529_s0  ;;  %p2030_p10 = scmp.lt.u32.totalorder %s2028_s2, %s2023_s8 }
  0x5c   : > { %p2026_p1 = pnand %p2025_p2, %p2024_p0  ;;  %p2032_p5 = scmp.lt.u32.totalorder %s2023_s8, %s2360_s10 }
  0x5d   : > { %p2031_p3 = por %p2030_p10, %p2029_p6 }
  0x5e   : > { %p2027_p13 = pneg %p2026_p1 }
  0x5f   : > { %p2033_p7 = por %p2032_p5, %p2031_p3 }
  0x61   : > { %p2034_p12 = pnand %p2033_p7, %p2027_p13 }
  0x63   : > { %2037 = shalt.err (!%p2034_p12)
}
  0x64   : > { %s2038_s5 = scalar_lea.vmem %s2369_s11, 256  ;;  %s2186_s6 = smov [#allocation3]  }
  0x65   : > { %p2039_p0 = scmp.ne.s32.totalorder %s2369_s11, %s2038_s5  ;;  %s2043_s13 = sshll.u32 %s2186_s6, 4  ;;  %s2044_s13 = int_to_ptr.vmem [resolvable:$false] %s2043_s13 }
  0x66   : > { %s2045_s3 = scalar_lea.vmem %s2044_s13, 512  ;;  %p2046_p4 = scmp.lt.s32.totalorder %s2369_s11, %s2044_s13 }
  0x67   : > { %p2041_p1 = pnand %p2039_p0, %p2025_p2  ;;  %p2047_p6 = scmp.lt.s32.totalorder %s2045_s3, %s2038_s5 }
  0x69   : > { %p2042_p9 = pneg %p2041_p1  ;;  %p2048_p10 = por %p2047_p6, %p2046_p4 }
  0x6b   : > { %p2049_p3 = pnand %p2048_p10, %p2042_p9 }
  0x6d   : > { %2052 = shalt.err (!%p2049_p3)
}
  0x6e   : > { %1730 = dma.hbm_to_vmem [thread:$0]  (!%p2365_p11), %s2360_s10, 256, %s2369_s11, %s209_s28  }
  0x6f   : > { %s229_s2 = sand.u32 1, %s2178_s20   ;;  %s2403_s22 = scalar_lea.hbm %s2374_s26, 256 }
  0x70   : > { %s233_s14 = scalar_lea.vmem [#allocation6], %s2351_s30  ;;  %s230_s9 = scalar_lea.sflag [#allocation7], %s229_s2 }
  0x71   : > { %s244_s8 = sshll.u32 %s233_s14, 4  ;;  %s2083_s27 = scalar_lea.hbm %s2374_s26, 512  ;;  %s245_s8 = int_to_ptr.vmem [resolvable:$true] %s244_s8 }
  0x72   : > { %p2054_p4 = scmp.ne.s32.totalorder %s2403_s22, %s2083_s27  ;;  %s2058_s10 = scalar_lea.hbm %s2530_s1, 1024 }
  0x73   : > { %p2059_p5 = scmp.lt.u32.totalorder %s2403_s22, %s2530_s1  ;;  %p2060_p7 = scmp.lt.u32.totalorder %s2058_s10, %s2083_s27 }
  0x74   : > { %p2056_p9 = pnand %p2054_p4, %p2025_p2  ;;  %p2062_p0 = scmp.lt.u32.totalorder %s2083_s27, %s2403_s22 }
  0x75   : > { %p2061_p12 = por %p2060_p7, %p2059_p5 }
  0x76   : > { %p2057_p13 = pneg %p2056_p9 }
  0x77   : > { %p2063_p1 = por %p2062_p0, %p2061_p12 }
  0x79   : > { %p2064_p6 = pnand %p2063_p1, %p2057_p13 }
  0x7b   : > { %2067 = shalt.err (!%p2064_p6)
}
  0x7c   : > { %s2068_s30 = scalar_lea.vmem %s245_s8, 256  ;;  %s2187_s26 = smov [#allocation6]  }
  0x7d   : > { %p2069_p10 = scmp.ne.s32.totalorder %s245_s8, %s2068_s30  ;;  %s2073_s13 = sshll.u32 %s2187_s26, 4  ;;  %s2074_s13 = int_to_ptr.vmem [resolvable:$false] %s2073_s13 }
  0x7e   : > { %s2075_s3 = scalar_lea.vmem %s2074_s13, 512  ;;  %p2076_p9 = scmp.lt.s32.totalorder %s245_s8, %s2074_s13 }
  0x7f   : > { %p2071_p3 = pnand %p2069_p10, %p2025_p2  ;;  %p2077_p8 = scmp.lt.s32.totalorder %s2075_s3, %s2068_s30 }
  0x81   : > { %p2072_p4 = pneg %p2071_p3  ;;  %p2078_p5 = por %p2077_p8, %p2076_p9 }
  0x83   : > { %p2079_p7 = pnand %p2078_p5, %p2072_p4 }
  0x85   : > { %2082 = shalt.err (!%p2079_p7)
}
  0x86   : > { %1733 = dma.hbm_to_vmem [thread:$0]  (!%p2365_p11), %s2403_s22, 256, %s245_s8, %s230_s9  }
  0x87   : > { %p2551_p13 = scmp.ne.s32.totalorder %s2543_s25, 0 }
  0x88   : > { %s2428_s2 = sand.u32 (!%p2551_p13), 1, %s2162_s16   ;;  %p2552_p8 = scmp.ne.s32.totalorder (!%p2551_p13), %s2541_s23, 0 }
  0x89   : > { %253 = sbr.rel (%p2551_p13) target bundleno = 740 (0x2e4), region = 36  ;;  %s1537_s14 = sshll.u32 (!%p2551_p13), %s2428_s2, 4 }
  0x8a   : > { %s256_s27 = scalar_lea.sflag (!%p2551_p13), [#allocation4], %s2428_s2  ;;  %s2432_s5 = scalar_lea.vmem (!%p2551_p13), [#allocation3], %s1537_s14 }
  0x90   : > { %2137 = dma.done.wait (%p2552_p8), %s256_s27, 256  }
  0x91   : > { %2139 = vsyncadd (%p2552_p8), %s256_s27, 4294967040  ;;  %s264_s12 = sand.u32 1, %s2246_s21   ;;  %s2439_s22 = scalar_lea.vmem [#allocation6], %s1537_s14 }
  0x92   : > { %s265_s25 = scalar_lea.sflag [#allocation7], %s264_s12 }
  0x93   : > { %2141 = dma.done.wait (%p2552_p8), %s265_s25, 256  }
  0x94   : > { %2143 = vsyncadd (%p2552_p8), %s265_s25, 4294967040  ;;  %p2553_p11 = scmp.eq.s32.totalorder %s2246_s21, 0 }
  0x96   : > { %2145 = dma.done.wait (%p2553_p11), [#allocation7], 12800   ;;  %p2554_p2 = pmov %p2553_p11 }
  0x98   : > { %2147 = vsyncadd (%p2554_p2), [#allocation7], 4294954496  ;;  %p2555_p12 = pmov %p2554_p2 }
  0x99   : > { %p2556_p0 = pmov %p2554_p2 }
  0x9a   : > { %2149 = dma.done.wait (%p2555_p12), [#allocation10], 2048  }
  0x9b   : > { %2151 = vsyncadd (%p2556_p0), [#allocation10], 4294965248  ;;  %v1799_v0 = vld [vmem:[#allocation8 + $0x144] ss:$16 sps:$4 sm:$0xff]   ;;  %v1801_v1 = vld [vmem:[#allocation8 + $0x14c] ss:$16 sps:$4 sm:$0xff]  }
  0x9c   : > { %623 = vmatprep.subr.bf16.mxu0 %v1799_v0  ;;  %v1803_v2 = vld [vmem:[#allocation8 + $0x140] ss:$16 sps:$4 sm:$0xff]   ;;  %v1804_v3 = vld [vmem:[#allocation8 + $0x148] ss:$16 sps:$4 sm:$0xff]   ;;  %664 = vmatprep.subr.bf16.mxu1 %v1801_v1  ;;  %v1805_v4 = vld [vmem:[#allocation8 + $0x164] ss:$16 sps:$4 sm:$0xff]  }
  0x9d   : > { %624 = vmatpush1.bf16.msra.mxu0 %v1803_v2  ;;  %665 = vmatpush1.bf16.msra.mxu1 %v1804_v3  ;;  %v1807_v5 = vld [vmem:[#allocation8 + $0x16c] ss:$16 sps:$4 sm:$0xff]   ;;  %v1809_v6 = vld [vmem:[#allocation8 + $0x160] ss:$16 sps:$4 sm:$0xff]   ;;  %v1810_v7 = vld [vmem:[#allocation8 + $0x168] ss:$16 sps:$4 sm:$0xff]  }
  0x9e   : > { %625 = vmatprep.subr.bf16.mxu0 %v1805_v4  ;;  %666 = vmatprep.subr.bf16.mxu1 %v1807_v5  ;;  %v1811_v8 = vld [vmem:[#allocation8 + $0x184] ss:$16 sps:$4 sm:$0xff]   ;;  %v1813_v9 = vld [vmem:[#allocation8 + $0x18c] ss:$16 sps:$4 sm:$0xff]   ;;  %v1815_v10 = vld [vmem:[#allocation8 + $0x180] ss:$16 sps:$4 sm:$0xff]  }
  0x9f   : > { %v1816_v11 = vld [vmem:[#allocation8 + $0x188] ss:$16 sps:$4 sm:$0xff]   ;;  %v1817_v12 = vld [vmem:[#allocation8 + $0x1a4] ss:$16 sps:$4 sm:$0xff]   ;;  %v1819_v13 = vld [vmem:[#allocation8 + $0x1ac] ss:$16 sps:$4 sm:$0xff]  }
  0xa0   : > { %v1821_v14 = vld [vmem:[#allocation8 + $0x1a0] ss:$16 sps:$4 sm:$0xff]   ;;  %v1822_v15 = vld [vmem:[#allocation8 + $0x1a8] ss:$16 sps:$4 sm:$0xff]   ;;  %v1823_v16 = vld [vmem:[#allocation8 + $0x1c4] ss:$16 sps:$4 sm:$0xff]  }
  0xa1   : > { %626 = vmatpush1.bf16.msra.mxu0 %v1809_v6  ;;  %667 = vmatpush1.bf16.msra.mxu1 %v1810_v7  ;;  %v1825_v17 = vld [vmem:[#allocation8 + $0x1cc] ss:$16 sps:$4 sm:$0xff]   ;;  %v1827_v18 = vld [vmem:[#allocation8 + $0x1c0] ss:$16 sps:$4 sm:$0xff]   ;;  %v1828_v19 = vld [vmem:[#allocation8 + $0x1c8] ss:$16 sps:$4 sm:$0xff]  }
  0xa2   : > { %627 = vmatprep.subr.bf16.mxu0 %v1811_v8  ;;  %668 = vmatprep.subr.bf16.mxu1 %v1813_v9  ;;  %v1829_v20 = vld [vmem:[#allocation8 + $0x1e4] ss:$16 sps:$4 sm:$0xff]   ;;  %v1831_v21 = vld [vmem:[#allocation8 + $0x1ec] ss:$16 sps:$4 sm:$0xff]   ;;  %v1833_v22 = vld [vmem:[#allocation8 + $0x1e0] ss:$16 sps:$4 sm:$0xff]  }
  0xa3   : > { %v1834_v23 = vld [vmem:[#allocation8 + $0x1e8] ss:$16 sps:$4 sm:$0xff]   ;;  %v1835_v24 = vld [vmem:[#allocation8 + $0x204] ss:$16 sps:$4 sm:$0xff]   ;;  %v1837_v25 = vld [vmem:[#allocation8 + $0x20c] ss:$16 sps:$4 sm:$0xff]  }
  0xa4   : > { %v1839_v26 = vld [vmem:[#allocation8 + $0x200] ss:$16 sps:$4 sm:$0xff]   ;;  %v1840_v27 = vld [vmem:[#allocation8 + $0x208] ss:$16 sps:$4 sm:$0xff]   ;;  %v1841_v28 = vld [vmem:[#allocation8 + $0x224] ss:$16 sps:$4 sm:$0xff]  }
  0xa5   : > { %628 = vmatpush1.bf16.msra.mxu0 %v1815_v10  ;;  %669 = vmatpush1.bf16.msra.mxu1 %v1816_v11  ;;  %vm311_vm0 = vcmask 261120   ;;  %v1843_v29 = vld [vmem:[#allocation8 + $0x22c] ss:$16 sps:$4 sm:$0xff]   ;;  %v1845_v32 = vld [vmem:[#allocation8 + $0x220] ss:$16 sps:$4 sm:$0xff]   ;;  %vm1112_vm1 = vcmask 654336  }
  0xa6   : > { %629 = vmatprep.subr.bf16.mxu0 %v1817_v12  ;;  %670 = vmatprep.subr.bf16.mxu1 %v1819_v13  ;;  %v309_v30 = vld [vmem:[%s2432_s5 + $0x8] sm:$0xff]  ;;  %v1847_v34 = vld [vmem:[#allocation8 + $0x244] ss:$16 sps:$4 sm:$0xff]   ;;  %v1851_v38 = vld [vmem:[#allocation8 + $0x240] ss:$16 sps:$4 sm:$0xff]   ;;  %s1541_s21 = sshll.u32 %s2428_s2, 3 }
  0xa7   : > { %312 = vst.msk [vmem:[#allocation2 + $0x8] sm:$0xff] %vm311_vm0, %v309_v30  ;;  %v314_v31 = vld [vmem:[%s2439_s22 + $0x8] sm:$0xff]  ;;  %v2458_v36 = vld [vmem:[%s2432_s5] sm:$0xff]  ;;  %s1665_s23 = sshll.u32 %s2170_s18, 7  ;;  %s305_s8 = scalar_lea.vmem [#allocation11], %s1541_s21 }
  0xa8   : > { %v1846_v33 = vld [vmem:[#allocation8 + $0x228] ss:$16 sps:$4 sm:$0xff]   ;;  %316 = vst.msk [vmem:[#allocation2 + $0x18] sm:$0xff] %vm311_vm0, %v314_v31  ;;  %v1849_v35 = vld [vmem:[#allocation8 + $0x24c] ss:$16 sps:$4 sm:$0xff]   ;;  %v313_v37 = vld [vmem:[%s2439_s22] sm:$0xff]  ;;  %s2480_s11 = scalar_lea.hbm %s2533_s4, %s1665_s23 }
  0xa9   : > { %630 = vmatpush1.bf16.msra.mxu0 %v1821_v14  ;;  %671 = vmatpush1.bf16.msra.mxu1 %v1822_v15  ;;  %v1852_v39 = vld [vmem:[#allocation8 + $0x248] ss:$16 sps:$4 sm:$0xff]   ;;  %v2462_v40 = vpack.c.bf16 %v313_v37, %v2458_v36  ;;  %v1853_v41 = vld [vmem:[#allocation8 + $0x264] ss:$16 sps:$4 sm:$0xff]   ;;  %v1855_v42 = vld [vmem:[#allocation8 + $0x26c] ss:$16 sps:$4 sm:$0xff]  }
  0xaa   : > { %631 = vmatprep.subr.bf16.mxu0 %v1823_v16  ;;  %672 = vmatprep.subr.bf16.mxu1 %v1825_v17  ;;  %v1857_v44 = vld [vmem:[#allocation8 + $0x260] ss:$16 sps:$4 sm:$0xff]   ;;  %v1858_v47 = vld [vmem:[#allocation8 + $0x268] ss:$16 sps:$4 sm:$0xff]   ;;  %v1861_v49 = vld [vmem:[#allocation8 + $0x4] ss:$16 sps:$4 sm:$0xff]  }
  0xab   : > { %v408_v43 = vshll.u32 %v2462_v40, 16  ;;  %v1864_v50 = vld [vmem:[#allocation8 + $0xc] ss:$16 sps:$4 sm:$0xff]   ;;  %v406_v51 = vshrl.u32 %v2462_v40, 16  ;;  %v1859_v56 = vld [vmem:[#allocation8] ss:$16 sps:$4 sm:$0xff]  }
  0xac   : > { %v1862_v57 = vld [vmem:[#allocation8 + $0x8] ss:$16 sps:$4 sm:$0xff]   ;;  %v1867_v60 = vld [vmem:[#allocation8 + $0x24] ss:$16 sps:$4 sm:$0xff]   ;;  %v1870_v61 = vld [vmem:[#allocation8 + $0x2c] ss:$16 sps:$4 sm:$0xff]  }
  0xad   : > { %632 = vmatpush1.bf16.msra.mxu0 %v1827_v18  ;;  %673 = vmatpush1.bf16.msra.mxu1 %v1828_v19  ;;  %v410_v52 = vrot.slane %v408_v43, 1  ;;  %v1865_v63 = vld [vmem:[#allocation8 + $0x20] ss:$16 sps:$4 sm:$0xff]   ;;  %v1868_v0 = vld [vmem:[#allocation8 + $0x28] ss:$16 sps:$4 sm:$0xff]   ;;  %s1396_s9 = sshll.u32 %s305_s8, 4  ;;  %s2482_s9 = int_to_ptr.vmem [resolvable:$true] %s1396_s9 }
  0xae   : > { %633 = vmatprep.subr.bf16.mxu0 %v1829_v20  ;;  %674 = vmatprep.subr.bf16.mxu1 %v1831_v21  ;;  %v318_v45 = vld [vmem:[#allocation2 + $0x8] sm:$0xff]  ;;  %v1873_v1 = vld [vmem:[#allocation8 + $0x44] ss:$16 sps:$4 sm:$0xff]   ;;  %v1871_v3 = vld [vmem:[#allocation8 + $0x40] ss:$16 sps:$4 sm:$0xff]   ;;  %s1382_s28 = scalar_lea.sflag [#allocation5], %s2428_s2 }
  0xaf   : > { %v320_v46 = vld [vmem:[#allocation2 + $0x18] sm:$0xff]  ;;  %v411_v58 = vor.u32 %v410_v52, %v406_v51  ;;  %v322_v62 = vpack.c.bf16 %v318_v45, %v318_v45  ;;  %v1879_v5 = vld [vmem:[#allocation8 + $0x64] ss:$16 sps:$4 sm:$0xff]   ;;  %v1877_v7 = vld [vmem:[#allocation8 + $0x60] ss:$16 sps:$4 sm:$0xff]   ;;  %s2084_s30 = scalar_lea.vmem %s2482_s9, 128 }
  0xb0   : > { %v364_v48 = vpack.c.bf16 %v320_v46, %v318_v45  ;;  %v1876_v2 = vld [vmem:[#allocation8 + $0x4c] ss:$16 sps:$4 sm:$0xff]   ;;  %v1874_v4 = vld [vmem:[#allocation8 + $0x48] ss:$16 sps:$4 sm:$0xff]   ;;  %v1885_v9 = vld [vmem:[#allocation8 + $0x84] ss:$16 sps:$4 sm:$0xff]   ;;  %p2085_p1 = scmp.ne.s32.totalorder %s2482_s9, %s2084_s30 }
  0xb1   : > { %634 = vmatpush1.bf16.msra.mxu0 %v1833_v22  ;;  %675 = vmatpush1.bf16.msra.mxu1 %v1834_v23  ;;  %v1882_v6 = vld [vmem:[#allocation8 + $0x6c] ss:$16 sps:$4 sm:$0xff]   ;;  %v1880_v8 = vld [vmem:[#allocation8 + $0x68] ss:$16 sps:$4 sm:$0xff]   ;;  %v1883_v11 = vld [vmem:[#allocation8 + $0x80] ss:$16 sps:$4 sm:$0xff]  }
  0xb2   : > { %635 = vmatprep.subr.bf16.mxu0 %v1835_v24  ;;  %676 = vmatprep.subr.bf16.mxu1 %v1837_v25  ;;  %v413_v53 = vshrl.u32 %v364_v48, 16  ;;  %v415_v54 = vshll.u32 %v364_v48, 16  ;;  %v1888_v10 = vld [vmem:[#allocation8 + $0x8c] ss:$16 sps:$4 sm:$0xff]   ;;  %v1886_v12 = vld [vmem:[#allocation8 + $0x88] ss:$16 sps:$4 sm:$0xff]  }
  0xb3   : > { %v1891_v13 = vld [vmem:[#allocation8 + $0xa4] ss:$16 sps:$4 sm:$0xff]   ;;  %v1894_v14 = vld [vmem:[#allocation8 + $0xac] ss:$16 sps:$4 sm:$0xff]   ;;  %v1889_v15 = vld [vmem:[#allocation8 + $0xa0] ss:$16 sps:$4 sm:$0xff]  }
  0xb4   : > { %v417_v55 = vrot.slane %v415_v54, 1  ;;  %v1892_v16 = vld [vmem:[#allocation8 + $0xa8] ss:$16 sps:$4 sm:$0xff]   ;;  %v1897_v17 = vld [vmem:[#allocation8 + $0xc4] ss:$16 sps:$4 sm:$0xff]   ;;  %p2557_p6 = scmp.ne.s32.totalorder %s2549_s29, 0 }
  0xb5   : > { %636 = vmatpush1.bf16.msra.mxu0 %v1839_v26  ;;  %677 = vmatpush1.bf16.msra.mxu1 %v1840_v27  ;;  %v1900_v18 = vld [vmem:[#allocation8 + $0xcc] ss:$16 sps:$4 sm:$0xff]   ;;  %v1895_v19 = vld [vmem:[#allocation8 + $0xc0] ss:$16 sps:$4 sm:$0xff]   ;;  %v1898_v20 = vld [vmem:[#allocation8 + $0xc8] ss:$16 sps:$4 sm:$0xff]  }
  0xb6   : > { %637 = vmatprep.subr.bf16.mxu0 %v1841_v28  ;;  %678 = vmatprep.subr.bf16.mxu1 %v1843_v29  ;;  %v418_v59 = vor.u32 %v417_v55, %v413_v53  ;;  %v1903_v21 = vld [vmem:[#allocation8 + $0xe4] ss:$16 sps:$4 sm:$0xff]   ;;  %v1906_v22 = vld [vmem:[#allocation8 + $0xec] ss:$16 sps:$4 sm:$0xff]   ;;  %v1901_v23 = vld [vmem:[#allocation8 + $0xe0] ss:$16 sps:$4 sm:$0xff]   ;;  %p2086_p10 = pnand %p2085_p1, %p2557_p6 }
  0xb7   : > { %v1904_v24 = vld [vmem:[#allocation8 + $0xe8] ss:$16 sps:$4 sm:$0xff]   ;;  %v1909_v25 = vld [vmem:[#allocation8 + $0x104] ss:$16 sps:$4 sm:$0xff]   ;;  %v1912_v26 = vld [vmem:[#allocation8 + $0x10c] ss:$16 sps:$4 sm:$0xff]  }
  0xb8   : > { %1582 = vmatprep.mubr.msk.bf16.mxu0 %vm311_vm0, %v418_v59  ;;  %1583 = vmatprep.mubr.msk.bf16.mxu1 %vm311_vm0, %v418_v59  ;;  %v1907_v27 = vld [vmem:[#allocation8 + $0x100] ss:$16 sps:$4 sm:$0xff]   ;;  %v1910_v28 = vld [vmem:[#allocation8 + $0x108] ss:$16 sps:$4 sm:$0xff]   ;;  %v1915_v29 = vld [vmem:[#allocation8 + $0x124] ss:$16 sps:$4 sm:$0xff]   ;;  %p2087_p3 = pneg %p2086_p10 }
  0xb9   : > { %638 = vmatpush1.bf16.msra.mxu0 %v1845_v32  ;;  %679 = vmatpush1.bf16.msra.mxu1 %v1846_v33  ;;  %v1918_v30 = vld [vmem:[#allocation8 + $0x12c] ss:$16 sps:$4 sm:$0xff]   ;;  %v1913_v31 = vld [vmem:[#allocation8 + $0x120] ss:$16 sps:$4 sm:$0xff]   ;;  %v1916_v32 = vld [vmem:[#allocation8 + $0x128] ss:$16 sps:$4 sm:$0xff]  }
  0xba   : > { %639 = vmatprep.subr.bf16.mxu0 %v1847_v34  ;;  %680 = vmatprep.subr.bf16.mxu1 %v1849_v35  ;;  %v1921_v33 = vld [vmem:[#allocation8 + $0x284] ss:$16 sps:$4 sm:$0xff]   ;;  %v321_v34 = vpack.c.bf16 %v2458_v36, %v2458_v36  ;;  %v1919_v35 = vld [vmem:[#allocation8 + $0x280] ss:$16 sps:$4 sm:$0xff]   ;;  %v1936_v46 = vld [vmem:[#allocation8 + $0x28c] ss:$16 sps:$4 sm:$0xff]  }
  0xbb   : > { %v1924_v37 = vld [vmem:[#allocation8 + $0x2a4] ss:$16 sps:$4 sm:$0xff]   ;;  %v1931_v45 = vld [vmem:[#allocation8 + $0x300] ss:$16 sps:$4 sm:$0xff]   ;;  %v1934_v48 = vld [vmem:[#allocation8 + $0x288] ss:$16 sps:$4 sm:$0xff]  }
  0xbc   : > { %v1930_v43 = vld [vmem:[#allocation8 + $0x2e4] ss:$16 sps:$4 sm:$0xff]   ;;  %v1942_v51 = vld [vmem:[#allocation8 + $0x2cc] ss:$16 sps:$4 sm:$0xff]   ;;  %v1940_v52 = vld [vmem:[#allocation8 + $0x2c8] ss:$16 sps:$4 sm:$0xff]  }
  0xbd   : > { %640 = vmatpush1.bf16.msra.mxu0 %v1851_v38  ;;  %681 = vmatpush1.bf16.msra.mxu1 %v1852_v39  ;;  %v1922_v38 = vld [vmem:[#allocation8 + $0x2a0] ss:$16 sps:$4 sm:$0xff]   ;;  %v2188_v39 = vmov 0   ;;  %v1933_v36 = vld [vmem:[#allocation8 + $0x304] ss:$16 sps:$4 sm:$0xff]   ;;  %v1952_v59 = vld [vmem:[#allocation9 + $0x8] sm:$0xff]  }
  0xbe   : > { %641 = vmatprep.subr.bf16.mxu0 %v1853_v41  ;;  %682 = vmatprep.subr.bf16.mxu1 %v1855_v42  ;;  %v1927_v41 = vld [vmem:[#allocation8 + $0x2c4] ss:$16 sps:$4 sm:$0xff]   ;;  %v1925_v42 = vld [vmem:[#allocation8 + $0x2c0] ss:$16 sps:$4 sm:$0xff]   ;;  %v1945_v53 = vld [vmem:[#allocation8 + $0x2ec] ss:$16 sps:$4 sm:$0xff]  }
  0xbf   : > { %v1943_v54 = vld [vmem:[#allocation8 + $0x2e8] ss:$16 sps:$4 sm:$0xff]   ;;  %s2189_s18 = smov [#allocation11]  }
  0xc0   : > { %v1946_v55 = vld [vmem:[#allocation8 + $0x308] ss:$16 sps:$4 sm:$0xff]   ;;  %s2088_s26 = sshll.u32 %s2189_s18, 4  ;;  %s2089_s26 = int_to_ptr.vmem [resolvable:$false] %s2088_s26 }
  0xc1   : > { %642 = vmatpush1.bf16.msra.mxu0 %v1857_v44  ;;  %683 = vmatpush1.bf16.msra.mxu1 %v1858_v47  ;;  %v1928_v44 = vld [vmem:[#allocation8 + $0x2e0] ss:$16 sps:$4 sm:$0xff]   ;;  %v1011_v47 = vrot.slane %v2462_v40, 1  ;;  %v1948_v40 = vld [vmem:[#allocation8 + $0x30c] ss:$16 sps:$4 sm:$0xff]   ;;  %s2090_s13 = scalar_lea.vmem %s2089_s26, 256  ;;  %p2091_p4 = scmp.lt.s32.totalorder %s2482_s9, %s2089_s26 }
  0xc2   : > { %908 = vmatprep.subr.bf16.mxu0 %v1861_v49  ;;  %949 = vmatprep.subr.bf16.mxu1 %v1864_v50  ;;  %v1939_v49 = vld [vmem:[#allocation8 + $0x2ac] ss:$16 sps:$4 sm:$0xff]   ;;  %v1937_v50 = vld [vmem:[#allocation8 + $0x2a8] ss:$16 sps:$4 sm:$0xff]   ;;  %p2092_p9 = scmp.lt.s32.totalorder %s2090_s13, %s2084_s30 }
  0xc4   : > { %656 = vmatmul.mubr.bf16.vlgmr.msra.gmra.mrb[0].mxu0 %v411_v58  ;;  %697 = vmatmul.mubr.bf16.vlgmr.msra.gmra.mrb[0].mxu1 %v411_v58  ;;  %v1951_v58 = vld [vmem:[#allocation9 + $0x48] sm:$0xff]   ;;  %p2093_p5 = por %p2092_p9, %p2091_p4 }
  0xc5   : > { %909 = vmatpush1.bf16.msra.mxu0 %v1859_v56  ;;  %950 = vmatpush1.bf16.msra.mxu1 %v1862_v57  ;;  %v1949_v56 = vld [vmem:[#allocation9 + $0x40] sm:$0xff]  }
  0xc6   : > { %910 = vmatprep.subr.bf16.mxu0 %v1867_v60  ;;  %951 = vmatprep.subr.bf16.mxu1 %v1870_v61  ;;  %v1950_v57 = vld [vmem:[#allocation9] sm:$0xff]   ;;  %v1953_v60 = vld [vmem:[#allocation9 + $0x50] sm:$0xff]   ;;  %p2094_p7 = pnand %p2093_p5, %p2087_p3 }
  0xc7   : > { %1624 = vmatprep.mubr.msk.bf16.mxu0 %vm311_vm0, %v322_v62  ;;  %1625 = vmatprep.mubr.msk.bf16.mxu1 %vm311_vm0, %v322_v62  ;;  %v1954_v61 = vld [vmem:[#allocation9 + $0x10] sm:$0xff]   ;;  %v1955_v62 = vld [vmem:[#allocation9 + $0x58] sm:$0xff]  }
  0xc9   : > { %911 = vmatpush1.bf16.msra.mxu0 %v1865_v63  ;;  %952 = vmatpush1.bf16.msra.mxu1 %v1868_v0  ;;  %v1956_v63 = vld [vmem:[#allocation9 + $0x18] sm:$0xff]   ;;  %v1957_v0 = vld [vmem:[#allocation9 + $0x60] sm:$0xff]  }
  0xca   : > { %912 = vmatprep.subr.bf16.mxu0 %v1873_v1  ;;  %953 = vmatprep.subr.bf16.mxu1 %v1876_v2  ;;  %v1958_v1 = vld [vmem:[#allocation9 + $0x20] sm:$0xff]   ;;  %v1959_v2 = vld [vmem:[#allocation9 + $0x68] sm:$0xff]  }
  0xcd   : > { %913 = vmatpush1.bf16.msra.mxu0 %v1871_v3  ;;  %954 = vmatpush1.bf16.msra.mxu1 %v1874_v4  ;;  %v1960_v3 = vld [vmem:[#allocation9 + $0x28] sm:$0xff]   ;;  %v1961_v4 = vld [vmem:[#allocation9 + $0x70] sm:$0xff]  }
  0xce   : > { %914 = vmatprep.subr.bf16.mxu0 %v1879_v5  ;;  %955 = vmatprep.subr.bf16.mxu1 %v1882_v6  ;;  %v1962_v5 = vld [vmem:[#allocation9 + $0x30] sm:$0xff]   ;;  %v1963_v6 = vld [vmem:[#allocation9 + $0x78] sm:$0xff]  }
  0xd1   : > { %915 = vmatpush1.bf16.msra.mxu0 %v1877_v7  ;;  %956 = vmatpush1.bf16.msra.mxu1 %v1880_v8  ;;  %v1964_v7 = vld [vmem:[#allocation9 + $0x38] sm:$0xff]  }
  0xd2   : > { %916 = vmatprep.subr.bf16.mxu0 %v1885_v9  ;;  %957 = vmatprep.subr.bf16.mxu1 %v1888_v10 }
  0xd5   : > { %917 = vmatpush1.bf16.msra.mxu0 %v1883_v11  ;;  %958 = vmatpush1.bf16.msra.mxu1 %v1886_v12 }
  0xd6   : > { %918 = vmatprep.subr.bf16.mxu0 %v1891_v13  ;;  %959 = vmatprep.subr.bf16.mxu1 %v1894_v14 }
  0xd9   : > { %919 = vmatpush1.bf16.msra.mxu0 %v1889_v15  ;;  %960 = vmatpush1.bf16.msra.mxu1 %v1892_v16 }
  0xda   : > { %920 = vmatprep.subr.bf16.mxu0 %v1897_v17  ;;  %961 = vmatprep.subr.bf16.mxu1 %v1900_v18 }
  0xdd   : > { %921 = vmatpush1.bf16.msra.mxu0 %v1895_v19  ;;  %962 = vmatpush1.bf16.msra.mxu1 %v1898_v20 }
  0xde   : > { %922 = vmatprep.subr.bf16.mxu0 %v1903_v21  ;;  %963 = vmatprep.subr.bf16.mxu1 %v1906_v22 }
  0xe1   : > { %923 = vmatpush1.bf16.msra.mxu0 %v1901_v23  ;;  %964 = vmatpush1.bf16.msra.mxu1 %v1904_v24 }
  0xe2   : > { %924 = vmatprep.subr.bf16.mxu0 %v1909_v25  ;;  %965 = vmatprep.subr.bf16.mxu1 %v1912_v26 }
  0xe5   : > { %925 = vmatpush1.bf16.msra.mxu0 %v1907_v27  ;;  %966 = vmatpush1.bf16.msra.mxu1 %v1910_v28 }
  0xe6   : > { %926 = vmatprep.subr.bf16.mxu0 %v1915_v29  ;;  %967 = vmatprep.subr.bf16.mxu1 %v1918_v30 }
  0xe9   : > { %927 = vmatpush1.bf16.msra.mxu0 %v1913_v31  ;;  %968 = vmatpush1.bf16.msra.mxu1 %v1916_v32 }
  0xea   : > { %1116 = vmatprep.subr.bf16.mxu1 %v1921_v33  ;;  %1670 = vmatprep.subr.bf16.mxu0 %v1949_v56 }
  0xec   : > { %941 = vmatmul.mubr.bf16.vlgmr.msra.gmra.mrb[0].mxu0 %v321_v34  ;;  %982 = vmatmul.mubr.bf16.vlgmr.msra.gmra.mrb[0].mxu1 %v321_v34 }
  0xed   : > { %1117 = vmatpush1.bf16.msra.mxu1 %v1919_v35  ;;  %1148 = vmatprep.mubr.bf16.mxu1 %v2188_v39 }
  0xee   : > { %1118 = vmatprep.subr.bf16.mxu1 %v1924_v37  ;;  %1671 = vmatpush3.bf16.msra.mxu0 %v1950_v57 }
  0xef   : > { %1672 = vmatprep.subr.bf16.mxu0 %v1951_v58 }
  0xf1   : > { %1119 = vmatpush1.bf16.msra.mxu1 %v1922_v38 }
  0xf2   : > { %1120 = vmatprep.subr.bf16.mxu1 %v1927_v41  ;;  %1673 = vmatpush3.bf16.msra.mxu0 %v1952_v59 }
  0xf3   : > { %1674 = vmatprep.subr.bf16.mxu0 %v1953_v60 }
  0xf5   : > { %1121 = vmatpush1.bf16.msra.mxu1 %v1925_v42 }
  0xf6   : > { %1122 = vmatprep.subr.bf16.mxu1 %v1930_v43  ;;  %1675 = vmatpush3.bf16.msra.mxu0 %v1954_v61 }
  0xf7   : > { %1676 = vmatprep.subr.bf16.mxu0 %v1955_v62 }
  0xf9   : > { %1123 = vmatpush1.bf16.msra.mxu1 %v1928_v44 }
  0xfa   : > { %1124 = vmatprep.subr.bf16.mxu1 %v1933_v36  ;;  %1677 = vmatpush3.bf16.msra.mxu0 %v1956_v63 }
  0xfb   : > { %1678 = vmatprep.subr.bf16.mxu0 %v1957_v0 }
  0xfd   : > { %1125 = vmatpush1.bf16.msra.mxu1 %v1931_v45 }
  0xfe   : > { %1157 = vmatprep.subr.bf16.mxu1 %v1936_v46  ;;  %1679 = vmatpush3.bf16.msra.mxu0 %v1958_v1 }
  0xff   : > { %1680 = vmatprep.subr.bf16.mxu0 %v1959_v2 }
 0x100   : > { %1646 = vmatmul.mubr.msk.bf16.vlgmr.msra.gmra.mrb[4].mxu1 %vm1112_vm1, %v1011_v47 }
 0x101   : > { %1158 = vmatpush1.bf16.msra.mxu1 %v1934_v48  ;;  %1189 = vmatprep.mubr.bf16.mxu1 %v2188_v39 }
 0x102   : > { %1159 = vmatprep.subr.bf16.mxu1 %v1939_v49  ;;  %1681 = vmatpush3.bf16.msra.mxu0 %v1960_v3 }
 0x103   : > { %1682 = vmatprep.subr.bf16.mxu0 %v1961_v4 }
 0x105   : > { %1160 = vmatpush1.bf16.msra.mxu1 %v1937_v50 }
 0x106   : > { %1161 = vmatprep.subr.bf16.mxu1 %v1942_v51  ;;  %1683 = vmatpush3.bf16.msra.mxu0 %v1962_v5 }
 0x107   : > { %1684 = vmatprep.subr.bf16.mxu0 %v1963_v6 }
 0x109   : > { %1162 = vmatpush1.bf16.msra.mxu1 %v1940_v52 }
 0x10a   : > { %1163 = vmatprep.subr.bf16.mxu1 %v1945_v53  ;;  %1685 = vmatpush3.bf16.msra.mxu0 %v1964_v7 }
 0x10d   : > { %1164 = vmatpush1.bf16.msra.mxu1 %v1943_v54 }
 0x10e   : > { %1165 = vmatprep.subr.bf16.mxu1 %v1948_v40 }
 0x111   : > { %1166 = vmatpush1.bf16.msra.mxu1 %v1946_v55 }
 0x114   : > { %1647 = vmatmul.mubr.msk.bf16.vlgmr.msra.gmra.mrb[0].mxu1 %vm1112_vm1, %v1011_v47 }
 0x1bf   : > { %v942_v8 = vpop.f32.mrb[0].mxu0 }
 0x1c0   : > { %v944_v9 = vpop.f32.mrb[1].mxu0 }
 0x1c1   : > { %v946_v10 = vpop.f32.mrb[2].mxu0 }
 0x1c2   : > { %v947_v11 = vpop.f32.mrb[3].mxu0 }
 0x1d3   : > { %v1150_v12 = vpop.f32.mrb[4].mxu1 }
 0x1d4   : > { %v1692_v13 = vadd.f32 %v1150_v12, %v942_v8  ;;  %v1152_v14 = vpop.f32.mrb[5].mxu1 }
 0x1d5   : > { %v1693_v15 = vadd.f32 %v1152_v14, %v944_v9  ;;  %v1154_v16 = vpop.f32.mrb[6].mxu1 }
 0x1d6   : > { %v1155_v17 = vpop.f32.mrb[7].mxu1  ;;  %v1202_v19 = vmul.f32 %v1692_v13, %v1692_v13 }
 0x1d7   : > { %v1203_v22 = vmul.f32 %v1693_v15, %v1693_v15 }
 0x1e7   : > { %v1191_v18 = vpop.f32.mrb[0].mxu1 }
 0x1e8   : > { %v1204_v20 = vmul.f32 %v1191_v18, %v1191_v18  ;;  %v1193_v21 = vpop.f32.mrb[1].mxu1 }
 0x1e9   : > { %v1205_v23 = vmul.f32 %v1193_v21, %v1193_v21  ;;  %v1195_v24 = vpop.f32.mrb[2].mxu1 }
 0x1ea   : > { %v1206_v25 = vadd.f32 %v1204_v20, %v1202_v19  ;;  %v1196_v26 = vpop.f32.mrb[3].mxu1 }
 0x1eb   : > { %v1207_v27 = vadd.f32 %v1205_v23, %v1203_v22 }
 0x1ec   : > { %v1208_v29 = vpack.c.bf16 %v1206_v25, %v1206_v25 }
 0x1ed   : > { %v1209_v28 = vpack.c.bf16 %v1207_v27, %v1207_v27 }
 0x1ef   : > { %1370 = vmatprep.mubr.bf16.mxu0 %v1209_v28 }
 0x1f0   : > { %1371 = vmatmul.mubr.bf16.vlgmr.msra.gmra.mrb[4].mxu0 %v1208_v29 }
 0x2c3   : > { %v1686_v30 = vpop.f32.mrb[4].mxu0 }
 0x2c4   : > { %v1687_v31 = vpop.f32.mrb[5].mxu0 }
 0x2c5   : > { %v1688_v32 = vadd.f32 %v1687_v31, %v1686_v30  ;;  %v1689_v33 = vpop.f32.mrb[6].mxu0 }
 0x2c6   : > { %v1690_v34 = vpop.f32.mrb[7].mxu0 }
 0x2c7   : > { %v1373_v35 = vadd.f32 1e-06, %v1688_v32 }
 0x2c9   : > { %1965 = vlog2.f32 %v1373_v35 }
 0x2d3   : > { %v1966_v37 = vpop.eup %1965 }
 0x2d4   : > { %v1379_v38 = vmul.f32 0.6931472, %v1966_v37 }
 0x2d6   : > { %1380 = vst [vmem:[%s305_s8] sm:$0xff] %v1379_v38 }
 0x2d7   : > { %2097 = shalt.err (!%p2094_p7)
}
 0x2d8   : > { %s2098_s3 = scalar_lea.hbm %s2480_s11, 128  ;;  %s2102_s27 = scalar_lea.hbm %s2533_s4, 256 }
 0x2d9   : > { %p2099_p13 = scmp.ne.s32.totalorder %s2480_s11, %s2098_s3  ;;  %p2103_p2 = scmp.lt.u32.totalorder %s2480_s11, %s2533_s4 }
 0x2da   : > { %p2104_p12 = scmp.lt.u32.totalorder %s2102_s27, %s2098_s3  ;;  %p2106_p1 = scmp.lt.u32.totalorder %s2098_s3, %s2480_s11 }
 0x2db   : > { %p2100_p8 = pnand %p2099_p13, %p2557_p6 }
 0x2dc   : > { %p2105_p0 = por %p2104_p12, %p2103_p2 }
 0x2dd   : > { %p2101_p11 = pneg %p2100_p8 }
 0x2de   : > { %p2107_p10 = por %p2106_p1, %p2105_p0 }
 0x2e0   : > { %p2108_p3 = pnand %p2107_p10, %p2101_p11 }
 0x2e2   : > { %2111 = shalt.err (!%p2108_p3)
}
 0x2e3   : > { %1718 = dma.vmem_to_hbm [thread:$0]  (%p2557_p6), %s2482_s9, 128, %s2480_s11, %s1382_s28  }
 0x2e4 PF: > { %s1408_s25 = sand.u32 1, %s2158_s15   ;;  %p2558_p4 = scmp.ne.s32.totalorder %s2542_s24, 0 }
 0x2e5   : > { %p2559_p9 = scmp.ge.s32.totalorder %s2178_s20, 2  ;;  %s1409_s22 = scalar_lea.sflag [#allocation5], %s1408_s25 }
 0x2e7   : > { %p1735_p5 = pnand %p2559_p9, %p2558_p4 }
 0x2e9   : > { %2153 = dma.done.wait (!%p1735_p5), %s1409_s22, 128  }
 0x2ea   : > { %2155 = vsyncadd (!%p1735_p5), %s1409_s22, 4294967168  ;;  %s24_s20 = sadd.s32 1, %s2178_s20   ;;  %s2560_s29 = sld [smem:[#allocation17_spill]] }
 0x2eb   : > { %p21_p7 = scmp.ge.s32.totalorder %s24_s20, 4   ;;  %s2561_s15 = smov %s2162_s16 }
 0x2ec   : > { %s2562_s16 = smov %s2166_s17  ;;  %s2563_s17 = smov %s2355_s7 }
 0x2ed   : > { %s2564_s18 = smov %s2174_s19  ;;  %23 = sbr.rel (!%p21_p7) target bundleno = 12 (0xc), region = 102 }
 0x2f0   : > { %s2565_s19 = smov %s2560_s29 }
 0x2f4   :  { %1414 = vsyncpa [#allocation4], 1 }
 0x2f5   :  { %1416 = vsyncpa [#allocation4 + $0x1], 1 }
 0x2f6   :  { %1417 = vsyncpa [#allocation7], 1 }
 0x2f7   :  { %1419 = vsyncpa [#allocation7 + $0x1], 1 }
 0x2f8   :  { %1420 = vsyncpa [#allocation10], 1 }
 0x2f9   :  { %1421 = vsyncpa [#allocation5], 1 }
 0x2fa   :  { %1423 = vsyncpa [#allocation5 + $0x1], 1 }

</bundles_post_ra>
